<compile_context>
chip_gen: v7x
topology: tpu7x:2x2x1
jax: 0.10.0
libtpu: 0.0.40
codegen_flags: <defaults>
</compile_context>

<pallas_src>
import math
import jax
import jax.numpy as jnp
from jax.experimental import pallas as pl
from jax.experimental.pallas import tpu as pltpu

LANE = 128


def make_qnetwork_kernel(n_layers: int):
    """Fused MLP kernel for `n_layers` = n_hidden + 1 linear layers."""

    def kernel(*refs):
        # refs = (x_ref, w0, b0, w1, b1, ..., w_out, b_out, out_ref)
        x_ref = refs[0]
        out_ref = refs[-1]
        param_refs = refs[1:-1]

        x = x_ref[...]                               # keep input dtype as-is
        for li in range(n_layers):
            w = param_refs[2 * li][...]              # bf16, (in, out) pre-transposed
            b = param_refs[2 * li + 1][...]          # f32,  (1, out)
            y = jnp.dot(x.astype(w.dtype), w,
                        preferred_element_type=jnp.float32) + b
            # PyTorch: ReLU only on hidden_layers[1:], never on layer 0 or output.
            if 1 <= li <= n_layers - 2:
                y = jnp.maximum(y, 0.0)
            x = y
        out_ref[...] = x.astype(out_ref.dtype)

    return kernel


def init_qnetwork_params(key, state_size, action_size, hidden_layers):
    """nn.Linear-style init (uniform +/-1/sqrt(fan_in)); weights stored (in, out)."""
    dims = [state_size] + list(hidden_layers) + [action_size]
    params = []
    for i in range(len(dims) - 1):
        fan_in, fan_out = dims[i], dims[i + 1]
        k = 1.0 / math.sqrt(fan_in)
        key, kw, kb = jax.random.split(key, 3)
        w = jax.random.uniform(kw, (fan_in, fan_out), jnp.float32, -k, k)
        b = jax.random.uniform(kb, (fan_out,), jnp.float32, -k, k)
        params.append((w, b))
    return params


def prepare_qnetwork_params(params, *, weight_dtype=jnp.bfloat16, lane=LANE):
    """One-time param conversion; cache the result and reuse it every forward.

    Hoists the bf16 cast, last-layer lane padding and bias (1, out) reshape out
    of the per-call hot path (review item: avoid re-materializing all params in
    HBM on every RL step).
    """
    n_layers = len(params)
    state_size = params[0][0].shape[0]
    action_size = params[-1][0].shape[1]
    out_pad = -(-action_size // lane) * lane         # lane-dense output width

    flat = []
    for li, (w, b) in enumerate(params):
        if li == n_layers - 1 and out_pad != action_size:
            w = jnp.pad(w, ((0, 0), (0, out_pad - action_size)))
            b = jnp.pad(b, (0, out_pad - action_size))
        flat.append(jnp.asarray(w, weight_dtype))                 # bf16 weights
        flat.append(jnp.asarray(b, jnp.float32).reshape(1, -1))   # f32 (1, out) bias

    return {
        "flat": tuple(flat),
        "n_layers": n_layers,
        "state_size": state_size,
        "action_size": action_size,
        "out_pad": out_pad,
    }


def _choose_tile_b(batch: int, max_tile: int = 1024) -> int:
    """Pick the batch tile.

    - Small batches (<= 256): a single full-batch tile; a second (empty) grid
      step would be pure overhead on single-TC v5e/v6e.
    - Larger batches: big tiles (up to 1024 rows) amortize the ~0.35 us
      per-grid-step overhead, but the batch is split into >= 2 tiles so the
      "parallel" grid axis can shard across both v7x TensorCores, and the
      effective matmul M stays >= 256 for the v6e/v7x 256x256 MXU.
    """
    if batch <= 256:
        return batch                                  # block == full dim
    half = (batch + 1) // 2
    return min(max_tile, -(-half // 8) * 8)           # multiple of 8, >= 2 tiles


def qnetwork_forward(state, prepared, *, max_tile_b: int = 1024,
                     out_dtype=jnp.float32, return_padded: bool = False,
                     vmem_limit_bytes: int = 32 * 1024 * 1024):
    """Fused QNetwork forward: one pallas_call, gridded over the batch."""
    flat = prepared["flat"]
    n_layers = prepared["n_layers"]
    action_size = prepared["action_size"]
    out_pad = prepared["out_pad"]
    batch, state_size = state.shape
    assert state_size == prepared["state_size"]

    tile_b = _choose_tile_b(batch, max_tile_b)
    grid = (pl.cdiv(batch, tile_b),)                  # ragged last tile is masked

    in_specs = [pl.BlockSpec((tile_b, state_size), lambda i: (i, 0))]
    for a in flat:
        # Constant index_map -> weights/biases stay VMEM-resident across steps.
        in_specs.append(pl.BlockSpec(a.shape, lambda i: (0, 0)))

    # Advisory cost hint so XLA can overlap this cheap call with neighbors.
    flops = sum(2 * batch * flat[2 * li].shape[0] * flat[2 * li].shape[1]
                for li in range(n_layers))
    bytes_accessed = (state.size * state.dtype.itemsize
                      + batch * out_pad * jnp.dtype(out_dtype).itemsize
                      + sum(a.size * a.dtype.itemsize for a in flat))

    out = pl.pallas_call(
        make_qnetwork_kernel(n_layers),
        out_shape=jax.ShapeDtypeStruct((batch, out_pad), out_dtype),
        grid=grid,
        in_specs=in_specs,
        out_specs=pl.BlockSpec((tile_b, out_pad), lambda i: (i, 0)),
        compiler_params=pltpu.CompilerParams(
            dimension_semantics=("parallel",),        # shard batch tiles across TCs
            vmem_limit_bytes=vmem_limit_bytes,
        ),
        cost_estimate=pl.CostEstimate(
            flops=flops, transcendentals=0, bytes_accessed=bytes_accessed),
    )(state, *flat)

    if return_padded:
        return out                                    # (batch, out_pad) slab
    return out[:, :action_size]


def qnetwork_reference_bf16(state, params):
    """Pure-JAX reference mirroring the kernel's bf16-weight / f32-acc math."""
    def lin(x, w, b):
        return jnp.dot(x.astype(jnp.bfloat16), w.astype(jnp.bfloat16),
                       preferred_element_type=jnp.float32) + b
    w, b = params[0]
    x = lin(state, w, b)                        # no ReLU on first hidden layer
    for w, b in params[1:-1]:
        x = jnp.maximum(lin(x, w, b), 0.0)
    w, b = params[-1]
    return lin(x, w, b)                         # no activation on output


def qnetwork_reference_f32(state, params):
    """Pure-f32 reference matching the PyTorch forward structurally."""
    w, b = params[0]
    x = state @ w + b
    for w, b in params[1:-1]:
        x = jnp.maximum(x @ w + b, 0.0)
    w, b = params[-1]
    return x @ w + b


if __name__ == "__main__":
    # Shapes consistent with the module's forward. batch=300 exercises a
    # 2-step grid with a ragged (masked) last tile; batch=2 exercises the
    # single full-batch tile path.
    state_size = 16
    hidden_layers = [128, 128]
    action_size = 4

    key = jax.random.PRNGKey(0)
    key_params, key_s0, key_s1 = jax.random.split(key, 3)

    params = init_qnetwork_params(key_params, state_size, action_size, hidden_layers)
    prepared = prepare_qnetwork_params(params)       # one-time, cached

    for batch, key_s in ((300, key_s0), (2, key_s1)):
        state = jax.random.normal(key_s, (batch, state_size), jnp.float32)

        out = qnetwork_forward(state, prepared)
        out = jax.block_until_ready(out)
        assert out.shape == (batch, action_size), out.shape

        ref_bf16 = qnetwork_reference_bf16(state, params)
        ref_f32 = qnetwork_reference_f32(state, params)
        assert jnp.allclose(out, ref_bf16, atol=1e-4, rtol=1e-4), \
            f"mismatch vs bf16 reference (batch={batch})"
        assert jnp.allclose(out, ref_f32, atol=5e-2, rtol=5e-2), \
            f"mismatch vs f32 reference (batch={batch})"

    print("KERNEL_OK")
</pallas_src>

<mosaic_0001>
module attributes {stable_mosaic.version = 11 : i64} {
  func.func @kernel(%arg0: i32, %arg1: memref<152x16xf32, #tpu.memory_space<vmem>>, %arg2: memref<16x128xbf16, #tpu.memory_space<vmem>>, %arg3: memref<1x128xf32, #tpu.memory_space<vmem>>, %arg4: memref<128x128xbf16, #tpu.memory_space<vmem>>, %arg5: memref<1x128xf32, #tpu.memory_space<vmem>>, %arg6: memref<128x128xbf16, #tpu.memory_space<vmem>>, %arg7: memref<1x128xf32, #tpu.memory_space<vmem>>, %arg8: memref<152x128xf32, #tpu.memory_space<vmem>>) attributes {dimension_semantics = [#tpu.dimension_semantics<parallel>], iteration_bounds = array<i64: 2>, scalar_prefetch = 0 : i64, scratch_operands = 0 : i64, tpu.core_type = #tpu.core_type<tc>, window_params = [{transform_indices = @transform_0, window_bounds = array<i64: 152, 16>}, {pipeline_mode = #tpu.pipeline_mode<synchronous>, transform_indices = @transform_1, window_bounds = array<i64: 16, 128>}, {pipeline_mode = #tpu.pipeline_mode<synchronous>, transform_indices = @transform_2, window_bounds = array<i64: 1, 128>}, {pipeline_mode = #tpu.pipeline_mode<synchronous>, transform_indices = @transform_3, window_bounds = array<i64: 128, 128>}, {pipeline_mode = #tpu.pipeline_mode<synchronous>, transform_indices = @transform_4, window_bounds = array<i64: 1, 128>}, {pipeline_mode = #tpu.pipeline_mode<synchronous>, transform_indices = @transform_5, window_bounds = array<i64: 128, 128>}, {pipeline_mode = #tpu.pipeline_mode<synchronous>, transform_indices = @transform_6, window_bounds = array<i64: 1, 128>}, {transform_indices = @transform_7, window_bounds = array<i64: 152, 128>}]} {
    %c0 = arith.constant 0 : index
    %c0_0 = arith.constant 0 : index
    %0 = vector.load %arg1[%c0, %c0_0] : memref<152x16xf32, #tpu.memory_space<vmem>>, vector<152x16xf32>
    %c0_1 = arith.constant 0 : index
    %c0_2 = arith.constant 0 : index
    %1 = vector.load %arg2[%c0_1, %c0_2] : memref<16x128xbf16, #tpu.memory_space<vmem>>, vector<16x128xbf16>
    %c0_3 = arith.constant 0 : index
    %c0_4 = arith.constant 0 : index
    %2 = vector.load %arg3[%c0_3, %c0_4] : memref<1x128xf32, #tpu.memory_space<vmem>>, vector<1x128xf32>
    %3 = arith.truncf %0 : vector<152x16xf32> to vector<152x16xbf16>
    %cst = arith.constant dense<0.000000e+00> : vector<152x128xf32>
    %4 = tpu.matmul %3, %1, %cst {dimension_numbers = #tpu.dot_dimension_numbers<[1], [0], [0], [1], [0, 0, 1, 1], [], []>} : vector<152x16xbf16>, vector<16x128xbf16>, vector<152x128xf32> -> vector<152x128xf32>
    %5 = vector.broadcast %2 : vector<1x128xf32> to vector<152x128xf32>
    %6 = arith.addf %4, %5 : vector<152x128xf32>
    %c0_5 = arith.constant 0 : index
    %c0_6 = arith.constant 0 : index
    %7 = vector.load %arg4[%c0_5, %c0_6] : memref<128x128xbf16, #tpu.memory_space<vmem>>, vector<128x128xbf16>
    %c0_7 = arith.constant 0 : index
    %c0_8 = arith.constant 0 : index
    %8 = vector.load %arg5[%c0_7, %c0_8] : memref<1x128xf32, #tpu.memory_space<vmem>>, vector<1x128xf32>
    %9 = arith.truncf %6 : vector<152x128xf32> to vector<152x128xbf16>
    %cst_9 = arith.constant dense<0.000000e+00> : vector<152x128xf32>
    %10 = tpu.matmul %9, %7, %cst_9 {dimension_numbers = #tpu.dot_dimension_numbers<[1], [0], [0], [1], [0, 0, 1, 1], [], []>} : vector<152x128xbf16>, vector<128x128xbf16>, vector<152x128xf32> -> vector<152x128xf32>
    %11 = vector.broadcast %8 : vector<1x128xf32> to vector<152x128xf32>
    %12 = arith.addf %10, %11 : vector<152x128xf32>
    %cst_10 = arith.constant 0.000000e+00 : f32
    %13 = vector.broadcast %cst_10 : f32 to vector<152x128xf32>
    %14 = arith.maximumf %12, %13 : vector<152x128xf32>
    %c0_11 = arith.constant 0 : index
    %c0_12 = arith.constant 0 : index
    %15 = vector.load %arg6[%c0_11, %c0_12] : memref<128x128xbf16, #tpu.memory_space<vmem>>, vector<128x128xbf16>
    %c0_13 = arith.constant 0 : index
    %c0_14 = arith.constant 0 : index
    %16 = vector.load %arg7[%c0_13, %c0_14] : memref<1x128xf32, #tpu.memory_space<vmem>>, vector<1x128xf32>
    %17 = arith.truncf %14 : vector<152x128xf32> to vector<152x128xbf16>
    %cst_15 = arith.constant dense<0.000000e+00> : vector<152x128xf32>
    %18 = tpu.matmul %17, %15, %cst_15 {dimension_numbers = #tpu.dot_dimension_numbers<[1], [0], [0], [1], [0, 0, 1, 1], [], []>} : vector<152x128xbf16>, vector<128x128xbf16>, vector<152x128xf32> -> vector<152x128xf32>
    %19 = vector.broadcast %16 : vector<1x128xf32> to vector<152x128xf32>
    %20 = arith.addf %18, %19 : vector<152x128xf32>
    %c0_16 = arith.constant 0 : index
    %c0_17 = arith.constant 0 : index
    %21 = vector.load %arg8[%c0_16, %c0_17] : memref<152x128xf32, #tpu.memory_space<vmem>>, vector<152x128xf32>
    tpu.vector_store %arg8[%c0_16, %c0_17], %20 {strides = array<i32>} : memref<152x128xf32, #tpu.memory_space<vmem>>, vector<152x128xf32>,
    return
  }
  func.func @transform_0(%arg0: i32) -> (i32, i32) {
    %c0_i32 = arith.constant 0 : i32
    %c0_i32_0 = arith.constant 0 : i32
    return %arg0, %c0_i32 : i32, i32
  }
  func.func @transform_1(%arg0: i32) -> (i32, i32) {
    %c0_i32 = arith.constant 0 : i32
    %c0_i32_0 = arith.constant 0 : i32
    %c0_i32_1 = arith.constant 0 : i32
    return %c0_i32, %c0_i32_0 : i32, i32
  }
  func.func @transform_2(%arg0: i32) -> (i32, i32) {
    %c0_i32 = arith.constant 0 : i32
    %c0_i32_0 = arith.constant 0 : i32
    %c0_i32_1 = arith.constant 0 : i32
    return %c0_i32, %c0_i32_0 : i32, i32
  }
  func.func @transform_3(%arg0: i32) -> (i32, i32) {
    %c0_i32 = arith.constant 0 : i32
    %c0_i32_0 = arith.constant 0 : i32
    %c0_i32_1 = arith.constant 0 : i32
    return %c0_i32, %c0_i32_0 : i32, i32
  }
  func.func @transform_4(%arg0: i32) -> (i32, i32) {
    %c0_i32 = arith.constant 0 : i32
    %c0_i32_0 = arith.constant 0 : i32
    %c0_i32_1 = arith.constant 0 : i32
    return %c0_i32, %c0_i32_0 : i32, i32
  }
  func.func @transform_5(%arg0: i32) -> (i32, i32) {
    %c0_i32 = arith.constant 0 : i32
    %c0_i32_0 = arith.constant 0 : i32
    %c0_i32_1 = arith.constant 0 : i32
    return %c0_i32, %c0_i32_0 : i32, i32
  }
  func.func @transform_6(%arg0: i32) -> (i32, i32) {
    %c0_i32 = arith.constant 0 : i32
    %c0_i32_0 = arith.constant 0 : i32
    %c0_i32_1 = arith.constant 0 : i32
    return %c0_i32, %c0_i32_0 : i32, i32
  }
  func.func @transform_7(%arg0: i32) -> (i32, i32) {
    %c0_i32 = arith.constant 0 : i32
    %c0_i32_0 = arith.constant 0 : i32
    return %arg0, %c0_i32 : i32, i32
  }
}

</mosaic_0001>

<bundles_post_ra>
// kernel: tpu_custom_call.1
= control target key start
LH: loop header
LB: loop body
LE: loop exit
PB: predicated region body
PF: predicated region fallthrough
CT: control target
= control target key end

     0   :  { %12 = vsyncpa [#allocation3], 0  ;;  %s1556_s0 = inlined_call_operand.vmem [shape: f32[300,16], index: 0, kind: input, shape index: {}]   ;;  %s1557_s1 = inlined_call_operand.vmem [shape: bf16[16,128], index: 1, kind: input, shape index: {}]   ;;  %s1558_s2 = inlined_call_operand.vmem [shape: f32[1,128], index: 2, kind: input, shape index: {}]   ;;  %s1559_s3 = inlined_call_operand.vmem [shape: bf16[128,128], index: 3, kind: input, shape index: {}]   ;;  %s1560_s4 = inlined_call_operand.vmem [shape: f32[1,128], index: 4, kind: input, shape index: {}]   ;;  %s1561_s5 = inlined_call_operand.vmem [shape: bf16[128,128], index: 5, kind: input, shape index: {}]   ;;  %s1562_s6 = inlined_call_operand.vmem [shape: f32[1,128], index: 6, kind: input, shape index: {}]   ;;  %s1563_s7 = inlined_call_operand.hbm [shape: f32[300,128], index: 7, kind: output, shape index: {}]  }
   0x1   :  { %14 = vsyncpa [#allocation3 + $0x1], 0  ;;  %s1316_s24 = smov 0   ;;  %s1318_s25 = smov 0  }
   0x2   :  { %s1320_s26 = smov 0   ;;  %s1322_s27 = smov 0  }
   0x3 LB: > { %s1337_s28 = sadd.s32 4294967295, %s1271_s27   ;;  %s968_s29 = sadd.s32 4294967294, %s1271_s27   ;;  %s1271_s27 = sphi %s1322_s27, %s1569_s27   ;;  %s1267_s26 = sphi %s1320_s26, %s1568_s26   ;;  %s1263_s25 = sphi %s1318_s25, %s1567_s25   ;;  %s1259_s24 = sphi %s1316_s24, %s1566_s24  }
   0x4   : > { %s1341_s30 = sadd.s32 1, %s1271_s27   ;;  %s179_s8 = sadd.s32 1, %s1267_s26 }
   0x5   : > { %s176_s9 = ssub.s32 %s1271_s27, %s1341_s30  ;;  %p189_p0 = scmp.ne.s32.totalorder %s1267_s26, %s1263_s25 }
   0x6   : > { %p177_p1 = scmp.eq.s32.totalorder %s176_s9, 0  ;;  %p190_p2 = scmp.eq.s32.totalorder %s1337_s28, 1 }
   0x7   : > { %p195_p3 = scmp.ne.s32.totalorder %s1263_s25, %s1259_s24  ;;  %p196_p4 = scmp.eq.s32.totalorder %s968_s29, 1 }
   0x8   : > { %s1352_s10 = scalar_select %p177_p1, %s1267_s26, %s179_s8  }
   0x9   : > { %p1354_p5 = por %p190_p2, %p189_p0  ;;  %p1358_p6 = por %p196_p4, %p195_p3 }
   0xa   : > { %p971_p7 = scmp.ge.s32.totalorder %s1271_s27, 1  ;;  %p241_p8 = scmp.lt.s32.totalorder %s1271_s27, 3 }
   0xc   : > { %p242_p9 = pnand %p971_p7, %p241_p8 }
   0xd   : > { %v1192_v0 = vld [vmem:[%s1557_s1] sm:$0xff] (!%p242_p9)   ;;  %s273_s15 = smul.u32 (!%p242_p9), 19, %s1337_s28  ;;  %vm325_vm0 = vcmask (!%p242_p9), 130048   ;;  %v1194_v17 = vld [vmem:[%s1559_s3 + $0x8] sm:$0xff] (!%p242_p9)   ;;  %v1195_v23 = vld [vmem:[%s1559_s3 + $0x10] sm:$0xff] (!%p242_p9)   ;;  %s270_s14 = sand.u32 (!%p242_p9), 1, %s1263_s25  }
   0xe   : > { %245 = sbr.rel (%p242_p9) target bundleno = 734 (0x2de), region = 48  ;;  %v1193_v1 = vld [vmem:[%s1559_s3] sm:$0xff] (!%p242_p9)   ;;  %1054 = vmatprep.subr.bf16.mxu0 (!%p242_p9), %v1192_v0  ;;  %1148 = vmatprep.subr.bf16.mxu1 (!%p242_p9), %v1192_v0  ;;  %v1196_v28 = vld [vmem:[%s1559_s3 + $0x18] sm:$0xff] (!%p242_p9)   ;;  %v1198_v34 = vld [vmem:[%s1559_s3 + $0x28] sm:$0xff] (!%p242_p9)   ;;  %s1273_s8 = smov (!%p242_p9), [#allocation2]  }
   0xf   : > { %p274_p10 = scmp.lt.s32.totalorder (!%p242_p9), %s273_s15, 37  ;;  %1055 = vmatpush3.bf16.msra.mxu0 (!%p242_p9), %v1192_v0  ;;  %1149 = vmatpush3.bf16.msra.mxu1 (!%p242_p9), %v1192_v0  ;;  %v1197_v31 = vld [vmem:[%s1559_s3 + $0x20] sm:$0xff] (!%p242_p9)   ;;  %v1199_v36 = vld [vmem:[%s1559_s3 + $0x30] sm:$0xff] (!%p242_p9)   ;;  %v1200_v37 = vld [vmem:[%s1559_s3 + $0x38] sm:$0xff] (!%p242_p9)   ;;  %s1006_s19 = smul.u32 (!%p242_p9), 2432, %s1337_s28 }
  0x10   : > { %1076 = vmatprep.subr.bf16.mxu1 (!%p242_p9), %v1193_v1  ;;  %v1201_v38 = vld [vmem:[%s1561_s5] sm:$0xff] (!%p242_p9)   ;;  %v1202_v39 = vld [vmem:[%s1561_s5 + $0x8] sm:$0xff] (!%p242_p9)   ;;  %v1203_v40 = vld [vmem:[%s1561_s5 + $0x10] sm:$0xff] (!%p242_p9)   ;;  %s1515_s28 = scalar_lea.sflag (!%p242_p9), [#allocation3], %s270_s14  ;;  %s1213_s9 = sshll.u32 (!%p242_p9), %s1273_s8, 4  ;;  %s1214_s9 = int_to_ptr.vmem [resolvable:$false] %s1213_s9 }
  0x11   : > { %1112 = vmatprep.subr.bf16.mxu0 (!%p242_p9), %v1201_v38  ;;  %v1204_v41 = vld [vmem:[%s1561_s5 + $0x18] sm:$0xff] (!%p242_p9)   ;;  %v1205_v42 = vld [vmem:[%s1561_s5 + $0x20] sm:$0xff] (!%p242_p9)   ;;  %v1206_v43 = vld [vmem:[%s1561_s5 + $0x28] sm:$0xff] (!%p242_p9)   ;;  %s1507_s23 = scalar_lea.hbm (!%p242_p9), %s1563_s7, %s1006_s19  ;;  %s1215_s13 = scalar_lea.vmem (!%p242_p9), %s1214_s9, 4864 }
  0x12   : > { %v973_v45 = vld [vmem:[%s1558_s2] ss:$0 sm:$0xff] (!%p242_p9) }
  0x15   : > { %s1571_s15 = smov (!%p274_p10, %s273_s15), 37 }
  0x16   : > { %s972_s18 = sshll.u32 %s1571_s15, 3  ;;  %s1150_s15 = smul.u32 152, %s270_s14 }
  0x17   : > { %s1374_s21 = scalar_lea.vmem %s1556_s0, %s972_s18 }
  0x18   : > { %v281_v2 = vld [vmem:[%s1374_s21] sm:$0xff]  ;;  %v282_v3 = vld [vmem:[%s1374_s21 + $0x8] sm:$0xff]  ;;  %v283_v4 = vld [vmem:[%s1374_s21 + $0x10] sm:$0xff]  ;;  %s1483_s18 = scalar_lea.vmem [#allocation2], %s1150_s15 }
  0x19   : > { %v303_v5 = vpack.c.bf16 %v282_v3, %v281_v2  ;;  %v284_v6 = vld [vmem:[%s1374_s21 + $0x18] sm:$0xff]  ;;  %v285_v7 = vld [vmem:[%s1374_s21 + $0x20] sm:$0xff]  ;;  %v286_v8 = vld [vmem:[%s1374_s21 + $0x28] sm:$0xff]  ;;  %s906_s20 = sshll.u32 %s1483_s18, 4  ;;  %s1509_s20 = int_to_ptr.vmem [resolvable:$true] %s906_s20 }
  0x1a   : > { %v304_v9 = vpack.c.bf16 %v284_v6, %v283_v4  ;;  %v305_v10 = vpack.c.bf16 %v286_v8, %v285_v7  ;;  %v287_v11 = vld [vmem:[%s1374_s21 + $0x30] sm:$0xff]  ;;  %v288_v12 = vld [vmem:[%s1374_s21 + $0x38] sm:$0xff]  ;;  %v289_v13 = vld [vmem:[%s1374_s21 + $0x40] sm:$0xff]  ;;  %s1209_s29 = scalar_lea.vmem %s1509_s20, 2432  ;;  %p1216_p0 = scmp.lt.s32.totalorder %s1509_s20, %s1214_s9 }
  0x1b   : > { %1056 = vmatprep.mubr.msk.bf16.mxu0 %vm325_vm0, %v303_v5  ;;  %v290_v14 = vld [vmem:[%s1374_s21 + $0x48] sm:$0xff]  ;;  %v297_v15 = vld [vmem:[%s1374_s21 + $0x80] sm:$0xff]  ;;  %v299_v19 = vld [vmem:[%s1374_s21 + $0x90] sm:$0xff]  ;;  %v306_v21 = vpack.c.bf16 %v288_v12, %v287_v11  ;;  %p1210_p11 = scmp.ne.s32.totalorder %s1509_s20, %s1209_s29  ;;  %p1217_p1 = scmp.lt.s32.totalorder %s1215_s13, %s1209_s29 }
  0x1c   : > { %1057 = vmatmul.mubr.msk.bf16.vlgmr.msra.gmra.mrb[0].mxu0 %vm325_vm0, %v304_v9  ;;  %v298_v16 = vld [vmem:[%s1374_s21 + $0x88] sm:$0xff]  ;;  %v312_v20 = vpack.c.bf16 %v299_v19, %v299_v19  ;;  %v307_v22 = vpack.c.bf16 %v290_v14, %v289_v13  ;;  %v291_v24 = vld [vmem:[%s1374_s21 + $0x50] sm:$0xff]  ;;  %v292_v25 = vld [vmem:[%s1374_s21 + $0x58] sm:$0xff] }
  0x1d   : > { %1060 = vmatprep.mubr.msk.bf16.mxu0 %vm325_vm0, %v305_v10  ;;  %v311_v18 = vpack.c.bf16 %v298_v16, %v297_v15  ;;  %v293_v26 = vld [vmem:[%s1374_s21 + $0x60] sm:$0xff]  ;;  %v294_v27 = vld [vmem:[%s1374_s21 + $0x68] sm:$0xff]  ;;  %v308_v29 = vpack.c.bf16 %v292_v25, %v291_v24  ;;  %v295_v32 = vld [vmem:[%s1374_s21 + $0x70] sm:$0xff]  ;;  %1113 = vmatpush3.bf16.msra.mxu0 %v1201_v38  ;;  %p1211_p12 = pnand %p1210_p11, %p1354_p5  ;;  %p1218_p2 = por %p1217_p1, %p1216_p0 }
  0x1e   : > { %v309_v30 = vpack.c.bf16 %v294_v27, %v293_v26  ;;  %v296_v33 = vld [vmem:[%s1374_s21 + $0x78] sm:$0xff]  ;;  %1114 = vmatprep.subr.bf16.mxu0 %v1202_v39 }
  0x1f   : > { %1072 = vmatprep.mubr.msk.bf16.mxu1 %vm325_vm0, %v311_v18  ;;  %v310_v35 = vpack.c.bf16 %v296_v33, %v295_v32  ;;  %v1456_v32 = vld [vmem:[%s1560_s4] ss:$0 sm:$0xff]  ;;  %p1212_p13 = pneg %p1211_p12 }
  0x20   : > { %1073 = vmatmul.mubr.msk.bf16.vlgmr.msra.gmra.mrb[0].mxu1 %vm325_vm0, %v312_v20 }
  0x21   : > { %1077 = vmatpush3.bf16.msra.mxu1 %v1193_v1  ;;  %1115 = vmatpush3.bf16.msra.mxu0 %v1202_v39  ;;  %p1219_p3 = pnand %p1218_p2, %p1212_p13 }
  0x22   : > { %1078 = vmatprep.subr.bf16.mxu1 %v1194_v17  ;;  %1116 = vmatprep.subr.bf16.mxu0 %v1203_v40 }
  0x24   : > { %1061 = vmatmul.mubr.msk.bf16.gmra.mrb[4].mxu0 %vm325_vm0, %v306_v21 }
  0x25   : > { %1064 = vmatprep.mubr.msk.bf16.mxu0 %vm325_vm0, %v307_v22  ;;  %1079 = vmatpush3.bf16.msra.mxu1 %v1194_v17 }
  0x26   : > { %1080 = vmatprep.subr.bf16.mxu1 %v1195_v23  ;;  %1117 = vmatpush3.bf16.msra.mxu0 %v1203_v40 }
  0x27   : > { %1118 = vmatprep.subr.bf16.mxu0 %v1204_v41 }
  0x29   : > { %1081 = vmatpush3.bf16.msra.mxu1 %v1195_v23 }
  0x2a   : > { %1082 = vmatprep.subr.bf16.mxu1 %v1196_v28  ;;  %1119 = vmatpush3.bf16.msra.mxu0 %v1204_v41 }
  0x2b   : > { %1120 = vmatprep.subr.bf16.mxu0 %v1205_v42 }
  0x2c   : > { %1065 = vmatmul.mubr.msk.bf16.gmra.mrb[8].mxu0 %vm325_vm0, %v308_v29 }
  0x2d   : > { %1068 = vmatprep.mubr.msk.bf16.mxu0 %vm325_vm0, %v309_v30  ;;  %1083 = vmatpush3.bf16.msra.mxu1 %v1196_v28  ;;  %v1207_v30 = vld [vmem:[%s1561_s5 + $0x30] sm:$0xff]  }
  0x2e   : > { %1084 = vmatprep.subr.bf16.mxu1 %v1197_v31  ;;  %1121 = vmatpush3.bf16.msra.mxu0 %v1205_v42 }
  0x2f   : > { %1122 = vmatprep.subr.bf16.mxu0 %v1206_v43 }
  0x31   : > { %1085 = vmatpush3.bf16.msra.mxu1 %v1197_v31  ;;  %v1208_v31 = vld [vmem:[%s1561_s5 + $0x38] sm:$0xff]  }
  0x32   : > { %1086 = vmatprep.subr.bf16.mxu1 %v1198_v34  ;;  %1123 = vmatpush3.bf16.msra.mxu0 %v1206_v43 }
  0x33   : > { %1124 = vmatprep.subr.bf16.mxu0 %v1207_v30 }
  0x34   : > { %1069 = vmatmul.mubr.msk.bf16.gmra.mrb[12].mxu0 %vm325_vm0, %v310_v35 }
  0x35   : > { %1087 = vmatpush3.bf16.msra.mxu1 %v1198_v34 }
  0x36   : > { %1088 = vmatprep.subr.bf16.mxu1 %v1199_v36  ;;  %1125 = vmatpush3.bf16.msra.mxu0 %v1207_v30 }
  0x37   : > { %1126 = vmatprep.subr.bf16.mxu0 %v1208_v31 }
  0x39   : > { %1089 = vmatpush3.bf16.msra.mxu1 %v1199_v36 }
  0x3a   : > { %1090 = vmatprep.subr.bf16.mxu1 %v1200_v37  ;;  %1127 = vmatpush3.bf16.msra.mxu0 %v1208_v31 }
  0x3d   : > { %1091 = vmatpush3.bf16.msra.mxu1 %v1200_v37 }
  0xef   : > { %v1058_v44 = vpop.f32.mrb[0].mxu0 }
  0xf0   : > { %v390_v46 = vpop.f32.mrb[1].mxu0  ;;  %v399_v48 = vadd.f32 %v1058_v44, %v973_v45 }
  0xf1   : > { %v1059_v47 = vpop.f32.mrb[2].mxu0  ;;  %v391_v51 = vadd.f32 %v973_v45, %v390_v46 }
  0xf2   : > { %v402_v49 = vadd.f32 %v1059_v47, %v973_v45  ;;  %v393_v50 = vpop.f32.mrb[3].mxu0 }
  0xf3   : > { %v394_v52 = vadd.f32 %v973_v45, %v393_v50  ;;  %v1074_v54 = vpop.f32.mrb[0].mxu1 }
  0xf4   : > { %v486_v53 = vpack.c.bf16 %v402_v49, %v399_v48  ;;  %v454_v56 = vpop.f32.mrb[1].mxu1  ;;  %v463_v28 = vadd.f32 %v1074_v54, %v973_v45 }
  0xf5   : > { %v485_v55 = vpack.c.bf16 %v394_v52, %v391_v51  ;;  %v455_v57 = vadd.f32 %v973_v45, %v454_v56  ;;  %v1075_v58 = vpop.f32.mrb[2].mxu1 }
  0xf6   : > { %v457_v60 = vpop.f32.mrb[3].mxu1  ;;  %v494_v29 = vpack.c.bf16 %v463_v28, %v463_v28 }
  0xf7   : > { %v1062_v59 = vpop.f32.mrb[4].mxu0  ;;  %1092 = vmatprep.mubr.bf16.mxu1 %v485_v55  ;;  %v458_v62 = vadd.f32 %v973_v45, %v457_v60 }
  0xf8   : > { %v406_v61 = vpop.f32.mrb[5].mxu0  ;;  %1093 = vmatmul.mubr.bf16.vlgmr.msra.gmra.mrb[4].mxu1 %v486_v53  ;;  %v415_v0 = vadd.f32 %v1062_v59, %v973_v45 }
  0xf9   : > { %v1063_v63 = vpop.f32.mrb[6].mxu0  ;;  %v493_v3 = vpack.c.bf16 %v458_v62, %v455_v57  ;;  %v407_v4 = vadd.f32 %v973_v45, %v406_v61 }
  0xfa   : > { %v418_v1 = vadd.f32 %v1063_v63, %v973_v45  ;;  %v409_v2 = vpop.f32.mrb[7].mxu0 }
  0xfb   : > { %v410_v5 = vadd.f32 %v973_v45, %v409_v2 }
  0xfc   : > { %v488_v6 = vpack.c.bf16 %v418_v1, %v415_v0 }
  0xfd   : > { %v487_v7 = vpack.c.bf16 %v410_v5, %v407_v4 }
  0xff   : > { %v1066_v8 = vpop.f32.mrb[8].mxu0  ;;  %1096 = vmatprep.mubr.bf16.mxu1 %v487_v7 }
 0x100   : > { %v422_v9 = vpop.f32.mrb[9].mxu0  ;;  %1097 = vmatmul.mubr.bf16.gmra.mrb[8].mxu1 %v488_v6  ;;  %v431_v11 = vadd.f32 %v1066_v8, %v973_v45 }
 0x101   : > { %v1067_v10 = vpop.f32.mrb[10].mxu0  ;;  %v423_v14 = vadd.f32 %v973_v45, %v422_v9 }
 0x102   : > { %v434_v12 = vadd.f32 %v1067_v10, %v973_v45  ;;  %v425_v13 = vpop.f32.mrb[11].mxu0 }
 0x103   : > { %v426_v15 = vadd.f32 %v973_v45, %v425_v13 }
 0x104   : > { %v490_v16 = vpack.c.bf16 %v434_v12, %v431_v11 }
 0x105   : > { %v489_v17 = vpack.c.bf16 %v426_v15, %v423_v14 }
 0x107   : > { %v1070_v18 = vpop.f32.mrb[12].mxu0  ;;  %1100 = vmatprep.mubr.bf16.mxu1 %v489_v17 }
 0x108   : > { %v438_v19 = vpop.f32.mrb[13].mxu0  ;;  %1101 = vmatmul.mubr.bf16.gmra.mrb[12].mxu1 %v490_v16  ;;  %v447_v21 = vadd.f32 %v1070_v18, %v973_v45 }
 0x109   : > { %v1071_v20 = vpop.f32.mrb[14].mxu0  ;;  %v439_v24 = vadd.f32 %v973_v45, %v438_v19 }
 0x10a   : > { %v450_v22 = vadd.f32 %v1071_v20, %v973_v45  ;;  %v441_v23 = vpop.f32.mrb[15].mxu0 }
 0x10b   : > { %v442_v25 = vadd.f32 %v973_v45, %v441_v23 }
 0x10c   : > { %v492_v26 = vpack.c.bf16 %v450_v22, %v447_v21 }
 0x10d   : > { %v491_v27 = vpack.c.bf16 %v442_v25, %v439_v24 }
 0x10f   : > { %1104 = vmatprep.mubr.bf16.mxu1 %v491_v27 }
 0x110   : > { %1105 = vmatmul.mubr.bf16.gmra.mrb[16].mxu1 %v492_v26 }
 0x111   : > { %1108 = vmatprep.mubr.bf16.mxu1 %v493_v3 }
 0x118   : > { %1109 = vmatmul.mubr.bf16.gmra.mrb[20].mxu1 %v494_v29 }
 0x1cb   : > { %v1094_v33 = vpop.f32.mrb[4].mxu1 }
 0x1cc   : > { %v592_v34 = vadd.f32 %v1094_v33, %v1456_v32  ;;  %v583_v35 = vpop.f32.mrb[5].mxu1 }
 0x1cd   : > { %v584_v36 = vadd.f32 %v1456_v32, %v583_v35  ;;  %v1095_v37 = vpop.f32.mrb[6].mxu1 }
 0x1ce   : > { %v595_v38 = vadd.f32 %v1095_v37, %v1456_v32  ;;  %v586_v39 = vpop.f32.mrb[7].mxu1  ;;  %v663_v41 = vmax.f32 %v592_v34, 0.0 }
 0x1cf   : > { %v587_v40 = vadd.f32 %v1456_v32, %v586_v39  ;;  %v661_v43 = vmax.f32 %v584_v36, 0.0 }
 0x1d0   : > { %v664_v42 = vmax.f32 %v595_v38, 0.0  ;;  %v994_v38 = vld [vmem:[%s1562_s6] ss:$0 sm:$0xff] }
 0x1d1   : > { %v662_v44 = vmax.f32 %v587_v40, 0.0 }
 0x1d2   : > { %v698_v45 = vpack.c.bf16 %v664_v42, %v663_v41 }
 0x1d3   : > { %v697_v46 = vpack.c.bf16 %v662_v44, %v661_v43  ;;  %v1098_v47 = vpop.f32.mrb[8].mxu1 }
 0x1d4   : > { %v608_v48 = vadd.f32 %v1098_v47, %v1456_v32  ;;  %v599_v49 = vpop.f32.mrb[9].mxu1 }
 0x1d5   : > { %v600_v50 = vadd.f32 %v1456_v32, %v599_v49  ;;  %v1099_v51 = vpop.f32.mrb[10].mxu1  ;;  %1128 = vmatprep.mubr.bf16.mxu0 %v697_v46 }
 0x1d6   : > { %v611_v52 = vadd.f32 %v1099_v51, %v1456_v32  ;;  %v602_v53 = vpop.f32.mrb[11].mxu1  ;;  %1129 = vmatmul.mubr.bf16.vlgmr.msra.gmra.mrb[16].mxu0 %v698_v45  ;;  %v667_v55 = vmax.f32 %v608_v48, 0.0 }
 0x1d7   : > { %v603_v54 = vadd.f32 %v1456_v32, %v602_v53  ;;  %v665_v57 = vmax.f32 %v600_v50, 0.0 }
 0x1d8   : > { %v668_v56 = vmax.f32 %v611_v52, 0.0 }
 0x1d9   : > { %v666_v58 = vmax.f32 %v603_v54, 0.0 }
 0x1da   : > { %v700_v59 = vpack.c.bf16 %v668_v56, %v667_v55 }
 0x1db   : > { %v699_v60 = vpack.c.bf16 %v666_v58, %v665_v57  ;;  %v1102_v61 = vpop.f32.mrb[12].mxu1 }
 0x1dc   : > { %v624_v62 = vadd.f32 %v1102_v61, %v1456_v32  ;;  %v615_v63 = vpop.f32.mrb[13].mxu1 }
 0x1dd   : > { %v616_v0 = vadd.f32 %v1456_v32, %v615_v63  ;;  %v1103_v1 = vpop.f32.mrb[14].mxu1  ;;  %1132 = vmatprep.mubr.bf16.mxu0 %v699_v60 }
 0x1de   : > { %v627_v2 = vadd.f32 %v1103_v1, %v1456_v32  ;;  %v618_v3 = vpop.f32.mrb[15].mxu1  ;;  %1133 = vmatmul.mubr.bf16.gmra.mrb[20].mxu0 %v700_v59  ;;  %v671_v5 = vmax.f32 %v624_v62, 0.0 }
 0x1df   : > { %v619_v4 = vadd.f32 %v1456_v32, %v618_v3  ;;  %v669_v7 = vmax.f32 %v616_v0, 0.0 }
 0x1e0   : > { %v672_v6 = vmax.f32 %v627_v2, 0.0 }
 0x1e1   : > { %v670_v8 = vmax.f32 %v619_v4, 0.0 }
 0x1e2   : > { %v702_v9 = vpack.c.bf16 %v672_v6, %v671_v5 }
 0x1e3   : > { %v701_v10 = vpack.c.bf16 %v670_v8, %v669_v7  ;;  %v1106_v11 = vpop.f32.mrb[16].mxu1 }
 0x1e4   : > { %v640_v12 = vadd.f32 %v1106_v11, %v1456_v32  ;;  %v631_v13 = vpop.f32.mrb[17].mxu1 }
 0x1e5   : > { %v632_v14 = vadd.f32 %v1456_v32, %v631_v13  ;;  %v1107_v15 = vpop.f32.mrb[18].mxu1  ;;  %1136 = vmatprep.mubr.bf16.mxu0 %v701_v10 }
 0x1e6   : > { %v643_v16 = vadd.f32 %v1107_v15, %v1456_v32  ;;  %v634_v17 = vpop.f32.mrb[19].mxu1  ;;  %1137 = vmatmul.mubr.bf16.gmra.mrb[24].mxu0 %v702_v9  ;;  %v675_v19 = vmax.f32 %v640_v12, 0.0 }
 0x1e7   : > { %v635_v18 = vadd.f32 %v1456_v32, %v634_v17  ;;  %v673_v21 = vmax.f32 %v632_v14, 0.0 }
 0x1e8   : > { %v676_v20 = vmax.f32 %v643_v16, 0.0 }
 0x1e9   : > { %v674_v22 = vmax.f32 %v635_v18, 0.0 }
 0x1ea   : > { %v704_v23 = vpack.c.bf16 %v676_v20, %v675_v19 }
 0x1eb   : > { %v703_v24 = vpack.c.bf16 %v674_v22, %v673_v21  ;;  %v1110_v25 = vpop.f32.mrb[20].mxu1 }
 0x1ec   : > { %v656_v26 = vadd.f32 %v1110_v25, %v1456_v32  ;;  %v647_v27 = vpop.f32.mrb[21].mxu1 }
 0x1ed   : > { %v648_v28 = vadd.f32 %v1456_v32, %v647_v27  ;;  %v1111_v29 = vpop.f32.mrb[22].mxu1  ;;  %1140 = vmatprep.mubr.bf16.mxu0 %v703_v24 }
 0x1ee   : > { %v650_v30 = vpop.f32.mrb[23].mxu1  ;;  %1141 = vmatmul.mubr.bf16.gmra.mrb[28].mxu0 %v704_v23  ;;  %v679_v33 = vmax.f32 %v656_v26, 0.0 }
 0x1ef   : > { %v651_v31 = vadd.f32 %v1456_v32, %v650_v30  ;;  %v677_v34 = vmax.f32 %v648_v28, 0.0 }
 0x1f0   : > { %v706_v37 = vpack.c.bf16 %v679_v33, %v679_v33 }
 0x1f1   : > { %v678_v35 = vmax.f32 %v651_v31, 0.0 }
 0x1f3   : > { %v705_v36 = vpack.c.bf16 %v678_v35, %v677_v34 }
 0x1f5   : > { %1144 = vmatprep.mubr.bf16.mxu0 %v705_v36 }
 0x1f6   : > { %1145 = vmatmul.mubr.bf16.gmra.mrb[32].mxu0 %v706_v37 }
 0x2a9   : > { %v1130_v39 = vpop.f32.mrb[16].mxu0 }
 0x2aa   : > { %v804_v40 = vadd.f32 %v1130_v39, %v994_v38  ;;  %v795_v41 = vpop.f32.mrb[17].mxu0 }
 0x2ab   : > { %v796_v42 = vadd.f32 %v994_v38, %v795_v41  ;;  %v1131_v43 = vpop.f32.mrb[18].mxu0 }
 0x2ac   : > { %875 = vst [vmem:[%s1483_s18 + $0x10] sm:$0xff] %v804_v40  ;;  %v807_v32 = vadd.f32 %v1131_v43, %v994_v38  ;;  %v798_v44 = vpop.f32.mrb[19].mxu0 }
 0x2ad   : > { %873 = vst [vmem:[%s1483_s18] sm:$0xff] %v796_v42  ;;  %v799_v45 = vadd.f32 %v994_v38, %v798_v44 }
 0x2ae   : > { %876 = vst [vmem:[%s1483_s18 + $0x18] sm:$0xff] %v807_v32 }
 0x2af   : > { %874 = vst [vmem:[%s1483_s18 + $0x8] sm:$0xff] %v799_v45 }
 0x2b1   : > { %v1134_v46 = vpop.f32.mrb[20].mxu0 }
 0x2b2   : > { %v820_v47 = vadd.f32 %v1134_v46, %v994_v38  ;;  %v811_v48 = vpop.f32.mrb[21].mxu0 }
 0x2b3   : > { %v812_v49 = vadd.f32 %v994_v38, %v811_v48  ;;  %v1135_v50 = vpop.f32.mrb[22].mxu0 }
 0x2b4   : > { %879 = vst [vmem:[%s1483_s18 + $0x30] sm:$0xff] %v820_v47  ;;  %v823_v51 = vadd.f32 %v1135_v50, %v994_v38  ;;  %v814_v52 = vpop.f32.mrb[23].mxu0 }
 0x2b5   : > { %877 = vst [vmem:[%s1483_s18 + $0x20] sm:$0xff] %v812_v49  ;;  %v815_v53 = vadd.f32 %v994_v38, %v814_v52 }
 0x2b6   : > { %880 = vst [vmem:[%s1483_s18 + $0x38] sm:$0xff] %v823_v51 }
 0x2b7   : > { %878 = vst [vmem:[%s1483_s18 + $0x28] sm:$0xff] %v815_v53 }
 0x2b9   : > { %v1138_v54 = vpop.f32.mrb[24].mxu0 }
 0x2ba   : > { %v836_v55 = vadd.f32 %v1138_v54, %v994_v38  ;;  %v827_v56 = vpop.f32.mrb[25].mxu0 }
 0x2bb   : > { %v828_v57 = vadd.f32 %v994_v38, %v827_v56  ;;  %v1139_v58 = vpop.f32.mrb[26].mxu0 }
 0x2bc   : > { %883 = vst [vmem:[%s1483_s18 + $0x50] sm:$0xff] %v836_v55  ;;  %v839_v59 = vadd.f32 %v1139_v58, %v994_v38  ;;  %v830_v60 = vpop.f32.mrb[27].mxu0 }
 0x2bd   : > { %881 = vst [vmem:[%s1483_s18 + $0x40] sm:$0xff] %v828_v57  ;;  %v831_v61 = vadd.f32 %v994_v38, %v830_v60 }
 0x2be   : > { %884 = vst [vmem:[%s1483_s18 + $0x58] sm:$0xff] %v839_v59 }
 0x2bf   : > { %882 = vst [vmem:[%s1483_s18 + $0x48] sm:$0xff] %v831_v61 }
 0x2c1   : > { %v1142_v62 = vpop.f32.mrb[28].mxu0 }
 0x2c2   : > { %v852_v63 = vadd.f32 %v1142_v62, %v994_v38  ;;  %v843_v0 = vpop.f32.mrb[29].mxu0 }
 0x2c3   : > { %v844_v1 = vadd.f32 %v994_v38, %v843_v0  ;;  %v1143_v2 = vpop.f32.mrb[30].mxu0 }
 0x2c4   : > { %887 = vst [vmem:[%s1483_s18 + $0x70] sm:$0xff] %v852_v63  ;;  %v855_v3 = vadd.f32 %v1143_v2, %v994_v38  ;;  %v846_v4 = vpop.f32.mrb[31].mxu0 }
 0x2c5   : > { %885 = vst [vmem:[%s1483_s18 + $0x60] sm:$0xff] %v844_v1  ;;  %v847_v5 = vadd.f32 %v994_v38, %v846_v4 }
 0x2c6   : > { %888 = vst [vmem:[%s1483_s18 + $0x78] sm:$0xff] %v855_v3 }
 0x2c7   : > { %886 = vst [vmem:[%s1483_s18 + $0x68] sm:$0xff] %v847_v5 }
 0x2c9   : > { %v1146_v6 = vpop.f32.mrb[32].mxu0 }
 0x2ca   : > { %v868_v7 = vadd.f32 %v1146_v6, %v994_v38  ;;  %v859_v8 = vpop.f32.mrb[33].mxu0 }
 0x2cb   : > { %v860_v9 = vadd.f32 %v994_v38, %v859_v8  ;;  %v1147_v10 = vpop.f32.mrb[34].mxu0 }
 0x2cc   : > { %891 = vst [vmem:[%s1483_s18 + $0x90] sm:$0xff] %v868_v7  ;;  %v862_v11 = vpop.f32.mrb[35].mxu0 }
 0x2cd   : > { %889 = vst [vmem:[%s1483_s18 + $0x80] sm:$0xff] %v860_v9  ;;  %v863_v12 = vadd.f32 %v994_v38, %v862_v11 }
 0x2cf   : > { %890 = vst [vmem:[%s1483_s18 + $0x88] sm:$0xff] %v863_v12 }
 0x2d0   : > { %1222 = shalt.err (!%p1219_p3)
}
 0x2d1   : > { %s1223_s14 = scalar_lea.hbm %s1507_s23, 2432  ;;  %s1227_s17 = scalar_lea.hbm %s1563_s7, 4864 }
 0x2d2   : > { %p1224_p4 = scmp.ne.s32.totalorder %s1507_s23, %s1223_s14  ;;  %p1228_p9 = scmp.lt.u32.totalorder %s1507_s23, %s1563_s7 }
 0x2d3   : > { %p1229_p10 = scmp.lt.u32.totalorder %s1227_s17, %s1223_s14  ;;  %p1231_p12 = scmp.lt.u32.totalorder %s1223_s14, %s1507_s23 }
 0x2d4   : > { %p1225_p7 = pnand %p1224_p4, %p1354_p5 }
 0x2d5   : > { %p1230_p11 = por %p1229_p10, %p1228_p9 }
 0x2d6   : > { %p1226_p8 = pneg %p1225_p7 }
 0x2d7   : > { %p1232_p13 = por %p1231_p12, %p1230_p11 }
 0x2d9   : > { %p1233_p0 = pnand %p1232_p13, %p1226_p8 }
 0x2db   : > { %1236 = shalt.err (!%p1233_p0)
}
 0x2dc   : > { %s1274_s21 = smov 128   ;;  %s1275_s22 = smov 8  }
 0x2dd   : > { %1151 = dma.vmem_to_hbm [thread:$0]  (%p1354_p5), %s1509_s20, 2432, %s1507_s23, %s1515_s28, %s1274_s21, %s1274_s21, %s1275_s22  }
 0x2de PF: > { %p1157_p1 = scmp.ge.s32.totalorder %s1271_s27, 2  ;;  %s921_s29 = sand.u32 1, %s1259_s24  }
 0x2df   : > { %s922_s8 = scalar_lea.sflag [#allocation3], %s921_s29 }
 0x2e0   : > { %p1154_p2 = pnand %p1157_p1, %p1358_p6 }
 0x2e2   : > { %1254 = dma.done.wait (!%p1154_p2), %s922_s8, 2432  }
 0x2e3   : > { %1256 = vsyncadd (!%p1154_p2), %s922_s8, 4294964864  ;;  %p17_p3 = scmp.ge.s32.totalorder %s1341_s30, 4   ;;  %s1566_s24 = smov %s1263_s25 }
 0x2e4   : > { %s1567_s25 = smov %s1267_s26  ;;  %s1568_s26 = smov %s1352_s10 }
 0x2e5   : > { %s1569_s27 = smov %s1341_s30  ;;  %19 = sbr.rel (!%p17_p3) target bundleno = 3 (0x3), region = 83 }
 0x2ec   :  { %927 = vsyncpa [#allocation3], 1 }
 0x2ed   :  { %929 = vsyncpa [#allocation3 + $0x1], 1 }

</bundles_post_ra>
